<compile_context>
chip_gen: v5e
topology: v5e:2x2
jax: 0.10.0
libtpu: 0.0.40
codegen_flags: <defaults>
</compile_context>

<pallas_src>
import jax
import jax.numpy as jnp
from jax.experimental import pallas as pl
from jax.experimental.pallas import tpu as pltpu


def _cdiv(a, b):
    return -(-a // b)


def _pad_to(a, m):
    return _cdiv(a, m) * m


def _disc_loss_kernel(ue_ref, ip_ref, ineg_ref, bp_ref, bn_ref,   # VMEM (TB,E)/(TB,1)
                      fscal_ref, nvalid_ref,                      # SMEM (2,) f32, (1,) i32
                      cls_ref, reg_ref,                           # VMEM (8,128) outputs
                      cls_acc, l2e_acc, l2b_acc):                 # VMEM scratch
    p = pl.program_id(0)
    t = pl.program_id(1)
    nt = pl.num_programs(1)
    tb = ue_ref.shape[0]

    @pl.when(t == 0)
    def _init():
        cls_acc[...] = jnp.zeros_like(cls_acc)
        l2e_acc[...] = jnp.zeros_like(l2e_acc)
        l2b_acc[...] = jnp.zeros_like(l2b_acc)

    u = ue_ref[...]        # (TB, E) f32 -- loaded once, shared by pos/neg/L2
    ip = ip_ref[...]       # (TB, E)
    ing = ineg_ref[...]    # (TB, E)
    bp = bp_ref[...]       # (TB, 1)
    bn = bn_ref[...]       # (TB, 1)

    # Per-row logits: the only per-step cross-lane reductions (over E).
    pos_logit = jnp.sum(u * ip, axis=1, keepdims=True) + bp    # (TB, 1)
    neg_logit = jnp.sum(u * ing, axis=1, keepdims=True) + bn   # (TB, 1)

    # Numerically stable BCE-with-logits: max(x,0) - x*y + log1p(exp(-|x|))
    pos_bce = (jnp.maximum(pos_logit, 0.0) - pos_logit
               + jnp.log1p(jnp.exp(-jnp.abs(pos_logit))))      # label y = 1
    neg_bce = (jnp.maximum(neg_logit, 0.0)
               + jnp.log1p(jnp.exp(-jnp.abs(neg_logit))))      # label y = 0

    # Mask out zero-padded tail rows (only affects BCE / bias-L2; padded
    # embedding rows are exactly zero so their L2 contribution is already 0).
    row0 = (p * nt + t) * tb
    ridx = jax.lax.broadcasted_iota(jnp.int32, (tb, 1), 0) + row0
    valid = (ridx < nvalid_ref[0]).astype(jnp.float32)         # (TB, 1)

    cls_acc[...] += valid * (pos_bce + neg_bce)
    # L2 (perec l2_loss = 0.5 * sum of squares); the user term appears in both
    # the pos and neg reg terms, so it is counted twice.
    l2e_acc[...] += 2.0 * u * u + ip * ip + ing * ing
    l2b_acc[...] += valid * (bp * bp + bn * bn)

    @pl.when(t == nt - 1)
    def _finalize():
        inv_batch = fscal_ref[0]
        half_regs = fscal_ref[1]
        cls_val = jnp.sum(cls_acc[...], axis=0, keepdims=True) * inv_batch   # (1,1)
        l2e = jnp.sum(jnp.sum(l2e_acc[...], axis=0, keepdims=True),
                      axis=1, keepdims=True)                                 # (1,1)
        l2b = jnp.sum(l2b_acc[...], axis=0, keepdims=True)                   # (1,1)
        reg_val = half_regs * (l2e + l2b)                                    # (1,1)
        # Broadcast the scalars across this chunk's (8,128) output tile.
        cls_ref[...] = jnp.zeros_like(cls_ref) + cls_val
        reg_ref[...] = jnp.zeros_like(reg_ref) + reg_val


class Discriminator:
    """JAX/Pallas port of the IRGAN Discriminator (forward pass only)."""

    def __init__(self, n_users, n_items, embed_size, regs, key):
        self.n_users = n_users
        self.n_items = n_items
        self.regs = float(regs)
        self.delta = 0.05
        ku, ki = jax.random.split(key)
        # nn.init.uniform_(-delta, delta); bias = 0
        self.user_embedding = jax.random.uniform(
            ku, (n_users, embed_size), jnp.float32, -self.delta, self.delta)
        self.item_embedding = jax.random.uniform(
            ki, (n_items, embed_size), jnp.float32, -self.delta, self.delta)
        self.bias = jnp.zeros((n_items,), jnp.float32)

    def forward(self, user, pos, neg):
        user = user.astype(jnp.int32)
        pos = pos.astype(jnp.int32)
        neg = neg.astype(jnp.int32)
        B = int(user.shape[0])
        E = int(self.user_embedding.shape[1])

        # --- wrapper-side gather into contiguous activation streams ---------
        u_e = jnp.take(self.user_embedding, user, axis=0)   # (B, E)
        i_p = jnp.take(self.item_embedding, pos, axis=0)    # (B, E)
        i_n = jnp.take(self.item_embedding, neg, axis=0)    # (B, E)
        b_p = jnp.take(self.bias, pos, axis=0)              # (B,)
        b_n = jnp.take(self.bias, neg, axis=0)              # (B,)

        # --- tiling: TB rows per step, P parallel chunks (v7x 2 TCs) --------
        TB_MAX = 256
        n_tiles = _cdiv(B, TB_MAX)
        P = 2 if n_tiles >= 2 else 1
        T = _cdiv(n_tiles, P)
        total_tiles = P * T
        TB = min(TB_MAX, _pad_to(_cdiv(B, total_tiles), 8))
        B_pad = total_tiles * TB

        pad = B_pad - B
        if pad:
            u_e = jnp.pad(u_e, ((0, pad), (0, 0)))
            i_p = jnp.pad(i_p, ((0, pad), (0, 0)))
            i_n = jnp.pad(i_n, ((0, pad), (0, 0)))
            b_p = jnp.pad(b_p, ((0, pad),))
            b_n = jnp.pad(b_n, ((0, pad),))
        b_p = b_p.reshape(B_pad, 1)
        b_n = b_n.reshape(B_pad, 1)

        fscal = jnp.array([1.0 / B, 0.5 * self.regs], dtype=jnp.float32)
        nvalid = jnp.array([B], dtype=jnp.int32)

        emb_spec = pl.BlockSpec((TB, E), lambda p, t, T=T: (p * T + t, 0))
        bias_spec = pl.BlockSpec((TB, 1), lambda p, t, T=T: (p * T + t, 0))
        smem_full = pl.BlockSpec(memory_space=pltpu.MemorySpace.SMEM)
        out_spec = pl.BlockSpec((8, 128), lambda p, t: (p, 0))

        grid_spec = pltpu.PrefetchScalarGridSpec(
            num_scalar_prefetch=0,
            grid=(P, T),
            in_specs=[emb_spec, emb_spec, emb_spec, bias_spec, bias_spec,
                      smem_full, smem_full],
            out_specs=(out_spec, out_spec),
            scratch_shapes=[pltpu.VMEM((TB, 1), jnp.float32),   # cls_acc
                            pltpu.VMEM((TB, E), jnp.float32),   # l2e_acc
                            pltpu.VMEM((TB, 1), jnp.float32)],  # l2b_acc
        )

        cls_out, reg_out = pl.pallas_call(
            _disc_loss_kernel,
            out_shape=(jax.ShapeDtypeStruct((P * 8, 128), jnp.float32),
                       jax.ShapeDtypeStruct((P * 8, 128), jnp.float32)),
            grid_spec=grid_spec,
            compiler_params=pltpu.CompilerParams(
                dimension_semantics=("parallel", "arbitrary"),
                vmem_limit_bytes=32 * 1024 * 1024),
        )(u_e, i_p, i_n, b_p, b_n, fscal, nvalid)

        # Each parallel chunk wrote its partial sums into its own (8,128) tile.
        cls_loss = jnp.sum(cls_out.reshape(P, 8, 128)[:, 0, 0])
        reg_loss = jnp.sum(reg_out.reshape(P, 8, 128)[:, 0, 0])
        return cls_loss, reg_loss


# ----------------------------- pure-JAX reference ---------------------------

def _bce_with_logits_ref(x, y):
    # PyTorch F.binary_cross_entropy_with_logits (stable form).
    return jnp.maximum(x, 0.0) - x * y + jnp.log1p(jnp.exp(-jnp.abs(x)))


def _reference_forward(model, user, pos, neg):
    """Pure-JAX reference matching the PyTorch forward semantics."""
    def get_cls_loss(u_idx, i_idx, label):
        u_e = model.user_embedding[u_idx]
        i_e = model.item_embedding[i_idx]
        b = model.bias[i_idx]
        logits = jnp.sum(u_e * i_e, axis=1) + b
        cls = jnp.mean(_bce_with_logits_ref(logits, label))
        reg = model.regs * 0.5 * (jnp.sum(u_e ** 2) + jnp.sum(i_e ** 2)
                                  + jnp.sum(b ** 2))
        return cls, reg

    bsz = user.shape[0]
    pc, pr = get_cls_loss(user, pos, jnp.ones((bsz,), jnp.float32))
    nc, nr = get_cls_loss(user, neg, jnp.zeros((bsz,), jnp.float32))
    return pc + nc, pr + nr


if __name__ == "__main__":
    root = jax.random.PRNGKey(0)
    regs = 1e-3

    configs = [
        # small / exact-tile case
        dict(n_users=32, n_items=64, embed_size=32, batch=8),
        # exercises the tail-row padding mask (B=10 -> TB=16, 6 pad rows)
        dict(n_users=32, n_items=64, embed_size=32, batch=10),
        # exercises multi-tile + 2-chunk parallel split (P=2) at full lane width
        dict(n_users=128, n_items=256, embed_size=128, batch=300),
    ]

    for ci, cfg in enumerate(configs):
        key = jax.random.fold_in(root, ci)
        kmodel, kbias, ku, kp, kn = jax.random.split(key, 5)

        model = Discriminator(cfg["n_users"], cfg["n_items"],
                              cfg["embed_size"], regs, kmodel)
        # The module inits bias to 0; perturb it here purely so the bias path
        # is actually exercised by the test.
        model.bias = jax.random.uniform(kbias, (cfg["n_items"],),
                                        jnp.float32, -0.1, 0.1)

        user = jax.random.randint(ku, (cfg["batch"],), 0, cfg["n_users"],
                                  dtype=jnp.int32)
        pos = jax.random.randint(kp, (cfg["batch"],), 0, cfg["n_items"],
                                 dtype=jnp.int32)
        neg = jax.random.randint(kn, (cfg["batch"],), 0, cfg["n_items"],
                                 dtype=jnp.int32)

        cls_loss, reg_loss = model.forward(user, pos, neg)
        cls_loss = jax.block_until_ready(cls_loss)
        reg_loss = jax.block_until_ready(reg_loss)

        cls_ref, reg_ref = _reference_forward(model, user, pos, neg)
        assert jnp.allclose(cls_loss, cls_ref, rtol=1e-4, atol=1e-5), \
            (cfg, cls_loss, cls_ref)
        assert jnp.allclose(reg_loss, reg_ref, rtol=1e-4, atol=1e-5), \
            (cfg, reg_loss, reg_ref)

    print("KERNEL_OK")
</pallas_src>

<mosaic_0001>
module attributes {stable_mosaic.version = 11 : i64} {
  func.func @_disc_loss_kernel(%arg0: i32, %arg1: i32, %arg2: memref<8x32xf32, #tpu.memory_space<vmem>>, %arg3: memref<8x32xf32, #tpu.memory_space<vmem>>, %arg4: memref<8x32xf32, #tpu.memory_space<vmem>>, %arg5: memref<8x1xf32, #tpu.memory_space<vmem>>, %arg6: memref<8x1xf32, #tpu.memory_space<vmem>>, %arg7: memref<2xf32, #tpu.memory_space<smem>>, %arg8: memref<1xi32, #tpu.memory_space<smem>>, %arg9: memref<8x128xf32, #tpu.memory_space<vmem>>, %arg10: memref<8x128xf32, #tpu.memory_space<vmem>>, %arg11: memref<8x1xf32, #tpu.memory_space<vmem>>, %arg12: memref<8x32xf32, #tpu.memory_space<vmem>>, %arg13: memref<8x1xf32, #tpu.memory_space<vmem>>) attributes {dimension_semantics = [#tpu.dimension_semantics<parallel>, #tpu.dimension_semantics<arbitrary>], iteration_bounds = array<i64: 1, 1>, scalar_prefetch = 0 : i64, scratch_operands = 3 : i64, tpu.core_type = #tpu.core_type<tc>, window_params = [{transform_indices = @transform_0, window_bounds = array<i64: 8, 32>}, {transform_indices = @transform_1, window_bounds = array<i64: 8, 32>}, {transform_indices = @transform_2, window_bounds = array<i64: 8, 32>}, {transform_indices = @transform_3, window_bounds = array<i64: 8, 1>}, {transform_indices = @transform_4, window_bounds = array<i64: 8, 1>}, {transform_indices = @transform_5, window_bounds = array<i64: 2>}, {transform_indices = @transform_6, window_bounds = array<i64: 1>}, {transform_indices = @transform_7, window_bounds = array<i64: 8, 128>}, {transform_indices = @transform_8, window_bounds = array<i64: 8, 128>}]} {
    %c0_i32 = arith.constant 0 : i32
    %0 = arith.cmpi eq, %arg1, %c0_i32 : i32
    %1 = arith.extui %0 : i1 to i32
    %c0_i32_0 = arith.constant 0 : i32
    %2 = arith.cmpi ne, %1, %c0_i32_0 : i32
    scf.if %2 {
      %cst_31 = arith.constant 0.000000e+00 : f32
      %69 = vector.broadcast %cst_31 : f32 to vector<8x1xf32>
      %c0_32 = arith.constant 0 : index
      %c0_33 = arith.constant 0 : index
      %70 = vector.load %arg11[%c0_32, %c0_33] : memref<8x1xf32, #tpu.memory_space<vmem>>, vector<8x1xf32>
      tpu.vector_store %arg11[%c0_32, %c0_33], %69 {strides = array<i32>} : memref<8x1xf32, #tpu.memory_space<vmem>>, vector<8x1xf32>,
      %cst_34 = arith.constant 0.000000e+00 : f32
      %71 = vector.broadcast %cst_34 : f32 to vector<8x32xf32>
      %c0_35 = arith.constant 0 : index
      %c0_36 = arith.constant 0 : index
      %72 = vector.load %arg12[%c0_35, %c0_36] : memref<8x32xf32, #tpu.memory_space<vmem>>, vector<8x32xf32>
      tpu.vector_store %arg12[%c0_35, %c0_36], %71 {strides = array<i32>} : memref<8x32xf32, #tpu.memory_space<vmem>>, vector<8x32xf32>,
      %cst_37 = arith.constant 0.000000e+00 : f32
      %73 = vector.broadcast %cst_37 : f32 to vector<8x1xf32>
      %c0_38 = arith.constant 0 : index
      %c0_39 = arith.constant 0 : index
      %74 = vector.load %arg13[%c0_38, %c0_39] : memref<8x1xf32, #tpu.memory_space<vmem>>, vector<8x1xf32>
      tpu.vector_store %arg13[%c0_38, %c0_39], %73 {strides = array<i32>} : memref<8x1xf32, #tpu.memory_space<vmem>>, vector<8x1xf32>,
    } else {
    }
    %c0 = arith.constant 0 : index
    %c0_1 = arith.constant 0 : index
    %3 = vector.load %arg2[%c0, %c0_1] : memref<8x32xf32, #tpu.memory_space<vmem>>, vector<8x32xf32>
    %c0_2 = arith.constant 0 : index
    %c0_3 = arith.constant 0 : index
    %4 = vector.load %arg3[%c0_2, %c0_3] : memref<8x32xf32, #tpu.memory_space<vmem>>, vector<8x32xf32>
    %c0_4 = arith.constant 0 : index
    %c0_5 = arith.constant 0 : index
    %5 = vector.load %arg4[%c0_4, %c0_5] : memref<8x32xf32, #tpu.memory_space<vmem>>, vector<8x32xf32>
    %c0_6 = arith.constant 0 : index
    %c0_7 = arith.constant 0 : index
    %6 = vector.load %arg5[%c0_6, %c0_7] : memref<8x1xf32, #tpu.memory_space<vmem>>, vector<8x1xf32>
    %c0_8 = arith.constant 0 : index
    %c0_9 = arith.constant 0 : index
    %7 = vector.load %arg6[%c0_8, %c0_9] : memref<8x1xf32, #tpu.memory_space<vmem>>, vector<8x1xf32>
    %8 = arith.mulf %3, %4 : vector<8x32xf32>
    %cst = arith.constant dense<0.000000e+00> : vector<8xf32>
    %9 = vector.multi_reduction <add>, %8, %cst [1] : vector<8x32xf32> to vector<8xf32>
    %10 = vector.shape_cast %9 : vector<8xf32> to vector<8x1xf32>
    %11 = arith.addf %10, %6 : vector<8x1xf32>
    %12 = arith.mulf %3, %5 : vector<8x32xf32>
    %cst_10 = arith.constant dense<0.000000e+00> : vector<8xf32>
    %13 = vector.multi_reduction <add>, %12, %cst_10 [1] : vector<8x32xf32> to vector<8xf32>
    %14 = vector.shape_cast %13 : vector<8xf32> to vector<8x1xf32>
    %15 = arith.addf %14, %7 : vector<8x1xf32>
    %cst_11 = arith.constant 0.000000e+00 : f32
    %16 = vector.broadcast %cst_11 : f32 to vector<8x1xf32>
    %17 = arith.maximumf %11, %16 : vector<8x1xf32>
    %18 = arith.subf %17, %11 : vector<8x1xf32>
    %19 = math.absf %11 : vector<8x1xf32>
    %cst_12 = arith.constant 0.000000e+00 : f32
    %20 = vector.broadcast %cst_12 : f32 to vector<8x1xf32>
    %21 = arith.subf %20, %19 : vector<8x1xf32>
    %22 = math.exp %21 : vector<8x1xf32>
    %23 = math.log1p %22 : vector<8x1xf32>
    %24 = arith.addf %18, %23 : vector<8x1xf32>
    %cst_13 = arith.constant 0.000000e+00 : f32
    %25 = vector.broadcast %cst_13 : f32 to vector<8x1xf32>
    %26 = arith.maximumf %15, %25 : vector<8x1xf32>
    %27 = math.absf %15 : vector<8x1xf32>
    %cst_14 = arith.constant 0.000000e+00 : f32
    %28 = vector.broadcast %cst_14 : f32 to vector<8x1xf32>
    %29 = arith.subf %28, %27 : vector<8x1xf32>
    %30 = math.exp %29 : vector<8x1xf32>
    %31 = math.log1p %30 : vector<8x1xf32>
    %32 = arith.addf %26, %31 : vector<8x1xf32>
    %c1_i32 = arith.constant 1 : i32
    %33 = arith.muli %arg0, %c1_i32 : i32
    %34 = arith.addi %33, %arg1 : i32
    %c8_i32 = arith.constant 8 : i32
    %35 = arith.muli %34, %c8_i32 : i32
    %36 = tpu.iota {dimensions = array<i32: 0>} : vector<8x1xi32>
    %37 = vector.broadcast %35 : i32 to vector<8x1xi32>
    %38 = arith.addi %36, %37 : vector<8x1xi32>
    %c0_15 = arith.constant 0 : index
    %39 = memref.load %arg8[%c0_15] : memref<1xi32, #tpu.memory_space<smem>>
    %40 = vector.broadcast %39 : i32 to vector<8x1xi32>
    %41 = arith.cmpi slt, %38, %40 : vector<8x1xi32>
    %42 = arith.extui %41 : vector<8x1xi1> to vector<8x1xi32>
    %43 = arith.sitofp %42 : vector<8x1xi32> to vector<8x1xf32>
    %c0_16 = arith.constant 0 : index
    %c0_17 = arith.constant 0 : index
    %44 = vector.load %arg11[%c0_16, %c0_17] : memref<8x1xf32, #tpu.memory_space<vmem>>, vector<8x1xf32>
    %45 = arith.addf %24, %32 : vector<8x1xf32>
    %46 = arith.mulf %43, %45 : vector<8x1xf32>
    %47 = arith.addf %44, %46 : vector<8x1xf32>
    %c0_18 = arith.constant 0 : index
    %c0_19 = arith.constant 0 : index
    %48 = vector.load %arg11[%c0_18, %c0_19] : memref<8x1xf32, #tpu.memory_space<vmem>>, vector<8x1xf32>
    tpu.vector_store %arg11[%c0_18, %c0_19], %47 {strides = array<i32>} : memref<8x1xf32, #tpu.memory_space<vmem>>, vector<8x1xf32>,
    %c0_20 = arith.constant 0 : index
    %c0_21 = arith.constant 0 : index
    %49 = vector.load %arg12[%c0_20, %c0_21] : memref<8x32xf32, #tpu.memory_space<vmem>>, vector<8x32xf32>
    %cst_22 = arith.constant 2.000000e+00 : f32
    %50 = vector.broadcast %cst_22 : f32 to vector<8x32xf32>
    %51 = arith.mulf %50, %3 : vector<8x32xf32>
    %52 = arith.mulf %51, %3 : vector<8x32xf32>
    %53 = arith.mulf %4, %4 : vector<8x32xf32>
    %54 = arith.addf %52, %53 : vector<8x32xf32>
    %55 = arith.mulf %5, %5 : vector<8x32xf32>
    %56 = arith.addf %54, %55 : vector<8x32xf32>
    %57 = arith.addf %49, %56 : vector<8x32xf32>
    %c0_23 = arith.constant 0 : index
    %c0_24 = arith.constant 0 : index
    %58 = vector.load %arg12[%c0_23, %c0_24] : memref<8x32xf32, #tpu.memory_space<vmem>>, vector<8x32xf32>
    tpu.vector_store %arg12[%c0_23, %c0_24], %57 {strides = array<i32>} : memref<8x32xf32, #tpu.memory_space<vmem>>, vector<8x32xf32>,
    %c0_25 = arith.constant 0 : index
    %c0_26 = arith.constant 0 : index
    %59 = vector.load %arg13[%c0_25, %c0_26] : memref<8x1xf32, #tpu.memory_space<vmem>>, vector<8x1xf32>
    %60 = arith.mulf %6, %6 : vector<8x1xf32>
    %61 = arith.mulf %7, %7 : vector<8x1xf32>
    %62 = arith.addf %60, %61 : vector<8x1xf32>
    %63 = arith.mulf %43, %62 : vector<8x1xf32>
    %64 = arith.addf %59, %63 : vector<8x1xf32>
    %c0_27 = arith.constant 0 : index
    %c0_28 = arith.constant 0 : index
    %65 = vector.load %arg13[%c0_27, %c0_28] : memref<8x1xf32, #tpu.memory_space<vmem>>, vector<8x1xf32>
    tpu.vector_store %arg13[%c0_27, %c0_28], %64 {strides = array<i32>} : memref<8x1xf32, #tpu.memory_space<vmem>>, vector<8x1xf32>,
    %c0_i32_29 = arith.constant 0 : i32
    %66 = arith.cmpi eq, %arg1, %c0_i32_29 : i32
    %67 = arith.extui %66 : i1 to i32
    %c0_i32_30 = arith.constant 0 : i32
    %68 = arith.cmpi ne, %67, %c0_i32_30 : i32
    scf.if %68 {
      %c0_31 = arith.constant 0 : index
      %69 = memref.load %arg7[%c0_31] : memref<2xf32, #tpu.memory_space<smem>>
      %c1 = arith.constant 1 : index
      %70 = memref.load %arg7[%c1] : memref<2xf32, #tpu.memory_space<smem>>
      %c0_32 = arith.constant 0 : index
      %c0_33 = arith.constant 0 : index
      %71 = vector.load %arg11[%c0_32, %c0_33] : memref<8x1xf32, #tpu.memory_space<vmem>>, vector<8x1xf32>
      %cst_34 = arith.constant dense<0.000000e+00> : vector<1xf32>
      %72 = vector.multi_reduction <add>, %71, %cst_34 [0] : vector<8x1xf32> to vector<1xf32>
      %73 = vector.shape_cast %72 : vector<1xf32> to vector<1x1xf32>
      %74 = vector.broadcast %69 : f32 to vector<1x1xf32>
      %75 = arith.mulf %73, %74 : vector<1x1xf32>
      %c0_35 = arith.constant 0 : index
      %c0_36 = arith.constant 0 : index
      %76 = vector.load %arg12[%c0_35, %c0_36] : memref<8x32xf32, #tpu.memory_space<vmem>>, vector<8x32xf32>
      %cst_37 = arith.constant dense<0.000000e+00> : vector<32xf32>
      %77 = vector.multi_reduction <add>, %76, %cst_37 [0] : vector<8x32xf32> to vector<32xf32>
      %78 = vector.shape_cast %77 : vector<32xf32> to vector<1x32xf32>
      %cst_38 = arith.constant dense<0.000000e+00> : vector<1xf32>
      %79 = vector.multi_reduction <add>, %78, %cst_38 [1] : vector<1x32xf32> to vector<1xf32>
      %80 = vector.shape_cast %79 : vector<1xf32> to vector<1x1xf32>
      %c0_39 = arith.constant 0 : index
      %c0_40 = arith.constant 0 : index
      %81 = vector.load %arg13[%c0_39, %c0_40] : memref<8x1xf32, #tpu.memory_space<vmem>>, vector<8x1xf32>
      %cst_41 = arith.constant dense<0.000000e+00> : vector<1xf32>
      %82 = vector.multi_reduction <add>, %81, %cst_41 [0] : vector<8x1xf32> to vector<1xf32>
      %83 = vector.shape_cast %82 : vector<1xf32> to vector<1x1xf32>
      %84 = arith.addf %80, %83 : vector<1x1xf32>
      %85 = vector.broadcast %70 : f32 to vector<1x1xf32>
      %86 = arith.mulf %85, %84 : vector<1x1xf32>
      %cst_42 = arith.constant 0.000000e+00 : f32
      %87 = vector.broadcast %cst_42 : f32 to vector<8x128xf32>
      %88 = vector.broadcast %75 : vector<1x1xf32> to vector<8x128xf32>
      %89 = arith.addf %87, %88 : vector<8x128xf32>
      %c0_43 = arith.constant 0 : index
      %c0_44 = arith.constant 0 : index
      %90 = vector.load %arg9[%c0_43, %c0_44] : memref<8x128xf32, #tpu.memory_space<vmem>>, vector<8x128xf32>
      tpu.vector_store %arg9[%c0_43, %c0_44], %89 {strides = array<i32>} : memref<8x128xf32, #tpu.memory_space<vmem>>, vector<8x128xf32>,
      %cst_45 = arith.constant 0.000000e+00 : f32
      %91 = vector.broadcast %cst_45 : f32 to vector<8x128xf32>
      %92 = vector.broadcast %86 : vector<1x1xf32> to vector<8x128xf32>
      %93 = arith.addf %91, %92 : vector<8x128xf32>
      %c0_46 = arith.constant 0 : index
      %c0_47 = arith.constant 0 : index
      %94 = vector.load %arg10[%c0_46, %c0_47] : memref<8x128xf32, #tpu.memory_space<vmem>>, vector<8x128xf32>
      tpu.vector_store %arg10[%c0_46, %c0_47], %93 {strides = array<i32>} : memref<8x128xf32, #tpu.memory_space<vmem>>, vector<8x128xf32>,
    } else {
    }
    return
  }
  func.func @transform_0(%arg0: i32, %arg1: i32) -> (i32, i32) {
    %c1_i32 = arith.constant 1 : i32
    %0 = arith.muli %arg0, %c1_i32 : i32
    %1 = arith.addi %0, %arg1 : i32
    %c0_i32 = arith.constant 0 : i32
    %c0_i32_0 = arith.constant 0 : i32
    return %1, %c0_i32 : i32, i32
  }
  func.func @transform_1(%arg0: i32, %arg1: i32) -> (i32, i32) {
    %c1_i32 = arith.constant 1 : i32
    %0 = arith.muli %arg0, %c1_i32 : i32
    %1 = arith.addi %0, %arg1 : i32
    %c0_i32 = arith.constant 0 : i32
    %c0_i32_0 = arith.constant 0 : i32
    return %1, %c0_i32 : i32, i32
  }
  func.func @transform_2(%arg0: i32, %arg1: i32) -> (i32, i32) {
    %c1_i32 = arith.constant 1 : i32
    %0 = arith.muli %arg0, %c1_i32 : i32
    %1 = arith.addi %0, %arg1 : i32
    %c0_i32 = arith.constant 0 : i32
    %c0_i32_0 = arith.constant 0 : i32
    return %1, %c0_i32 : i32, i32
  }
  func.func @transform_3(%arg0: i32, %arg1: i32) -> (i32, i32) {
    %c1_i32 = arith.constant 1 : i32
    %0 = arith.muli %arg0, %c1_i32 : i32
    %1 = arith.addi %0, %arg1 : i32
    %c0_i32 = arith.constant 0 : i32
    %c0_i32_0 = arith.constant 0 : i32
    return %1, %c0_i32 : i32, i32
  }
  func.func @transform_4(%arg0: i32, %arg1: i32) -> (i32, i32) {
    %c1_i32 = arith.constant 1 : i32
    %0 = arith.muli %arg0, %c1_i32 : i32
    %1 = arith.addi %0, %arg1 : i32
    %c0_i32 = arith.constant 0 : i32
    %c0_i32_0 = arith.constant 0 : i32
    return %1, %c0_i32 : i32, i32
  }
  func.func @transform_5(%arg0: i32, %arg1: i32) -> i32 {
    %c0_i32 = arith.constant 0 : i32
    %c0_i32_0 = arith.constant 0 : i32
    return %c0_i32 : i32
  }
  func.func @transform_6(%arg0: i32, %arg1: i32) -> i32 {
    %c0_i32 = arith.constant 0 : i32
    %c0_i32_0 = arith.constant 0 : i32
    return %c0_i32 : i32
  }
  func.func @transform_7(%arg0: i32, %arg1: i32) -> (i32, i32) {
    %c0_i32 = arith.constant 0 : i32
    %c0_i32_0 = arith.constant 0 : i32
    return %arg0, %c0_i32 : i32, i32
  }
  func.func @transform_8(%arg0: i32, %arg1: i32) -> (i32, i32) {
    %c0_i32 = arith.constant 0 : i32
    %c0_i32_0 = arith.constant 0 : i32
    return %arg0, %c0_i32 : i32, i32
  }
}

</mosaic_0001>

<bundles_post_ra>
// kernel: tpu_custom_call.1
= control target key start
LH: loop header
LB: loop body
LE: loop exit
PB: predicated region body
PF: predicated region fallthrough
CT: control target
= control target key end

     0   :  { %15 = vsyncpa [#allocation7], 0  ;;  %s529_s0 = inlined_call_operand.vmem [shape: f32[8,32], index: 0, kind: input, shape index: {}]   ;;  %s530_s1 = inlined_call_operand.vmem [shape: f32[8,32], index: 1, kind: input, shape index: {}]   ;;  %s531_s2 = inlined_call_operand.hbm [shape: f32[8,32], index: 2, kind: input, shape index: {}]   ;;  %s532_s3 = inlined_call_operand.vmem [shape: f32[8,1], index: 3, kind: input, shape index: {}]   ;;  %s533_s4 = inlined_call_operand.vmem [shape: f32[8,1], index: 4, kind: input, shape index: {}]   ;;  %s534_s5 = inlined_call_operand.vmem [shape: f32[2], index: 5, kind: input, shape index: {}]   ;;  %s535_s6 = inlined_call_operand.<no memory space> [shape: s32[1], index: 6, kind: input, shape index: {}]   ;;  %s536_s7 = inlined_call_operand.hbm [shape: f32[8,128], index: 7, kind: output, shape index: {0}]   ;;  %s537_s8 = inlined_call_operand.hbm [shape: f32[8,128], index: 8, kind: output, shape index: {1}]  }
   0x1   :  { %16 = vsyncpa [#allocation9], 0 }
   0x2   :  { %17 = vsyncpa [#allocation8], 0 }
   0x3   :  { %18 = vsyncpa [#allocation13], 0  ;;  %s43_s29 = sshll.u32 %s531_s2, 4  ;;  %s439_s30 = smov [#allocation6]   ;;  %s44_s29 = int_to_ptr.hbm [resolvable:$true] %s43_s29 }
   0x4   :  { %s45_s9 = sshll.u32 %s439_s30, 4  ;;  %s70_s12 = sshll.u32 %s534_s5, 4  ;;  %s46_s9 = int_to_ptr.vmem [resolvable:$true] %s45_s9  ;;  %s71_s12 = int_to_ptr.vmem [resolvable:$true] %s70_s12 }
   0x5   :  { %48 = dma.hbm_to_vmem [thread:$0]  %s44_s29, 128, %s46_s9, [#allocation7]  }
   0x6   :  { %s440_s13 = smov [#allocation10]  }
   0x7   :  { %73 = dma.vmem_to_smem %s71_s12, 16, %s440_s13, [#allocation9]  }
   0x8   :  { %431 = dma.done.wait [#allocation7], 128  }
   0x9   :  { %432 = vsyncadd [#allocation7], 4294967168 }
   0xa   :  { %433 = dma.done.wait [#allocation9], 16  }
   0xb   :  { %434 = vsyncadd [#allocation9], 4294967280 }
   0xc   :  { %84 = sfence }
   0xd   :  { %vm136_vm0 = vcmask 261120   ;;  %v139_v0 = vld [vmem:[%s529_s0] sm:$0xff]  ;;  %v441_v5 = vmov 0.0   ;;  %v141_v6 = vld [vmem:[#allocation6] sm:$0xff]  ;;  %vm134_vm1 = vcmask 7168   ;;  %v188_v27 = vlaneseq  ;;  %s288_s23 = sshll.u32 %s537_s8, 4  ;;  %s289_s23 = int_to_ptr.hbm [resolvable:$true] %s288_s23 }
   0xe   :  { %v140_v1 = vld [vmem:[%s530_s1] sm:$0xff]  ;;  %v204_v3 = vmul.f32 2.0, %v139_v0  ;;  %137 = vst.msk [vmem:[#allocation3] sm:$0xff] %vm136_vm0, %v441_v5  ;;  %v208_v9 = vmul.f32 %v141_v6, %v141_v6  ;;  %v150_v11 = vmul.f32 %v141_v6, %v139_v0  ;;  %v193_v35 = vstv %s535_s6  ;;  %s443_s6 = smov [#allocation12]   ;;  %s444_s24 = smov [#allocation11]  }
   0xf   :  { %v144_v2 = vmul.f32 %v140_v1, %v139_v0  ;;  %v206_v4 = vmul.f32 %v140_v1, %v140_v1  ;;  %135 = vst.msk [vmem:[#allocation2] sm:$0xff] %vm134_vm1, %v441_v5  ;;  %v142_v25 = vld [vmem:[%s532_s3] sm:$0xff]  ;;  %v189_v32 = vshrl.u32 %v188_v27, 7  ;;  %v442_v45 = vmov 0   ;;  %s329_s3 = sld [smem:[#allocation10 + $0x1]]  ;;  %s286_s20 = sshll.u32 %s443_s6, 4  ;;  %s287_s20 = int_to_ptr.vmem [resolvable:$true] %s286_s20 }
  0x10   :  { %v205_v8 = vmul.f32 %v204_v3, %v139_v0  ;;  %v151_v14 = vsel %vm136_vm0, %v150_v11, 0.0  ;;  %138 = vst.msk [vmem:[#allocation4] sm:$0xff] %vm134_vm1, %v441_v5  ;;  %v143_v30 = vld [vmem:[%s533_s4] sm:$0xff]  ;;  %v213_v31 = vmul.f32 %v142_v25, %v142_v25  ;;  %336 = vset.pattern.permute.xlu1 %v442_v45  ;;  %337 = vset.pattern.permute.xlu2 %v442_v45  ;;  %s222_s4 = sld [smem:[#allocation10]]  ;;  %s275_s25 = sshll.u32 %s444_s24, 4  ;;  %s276_s25 = int_to_ptr.vmem [resolvable:$true] %s275_s25 }
  0x11   :  { %v146_v7 = vsel %vm136_vm0, %v144_v2, 0.0  ;;  %v214_v33 = vmul.f32 %v143_v30, %v143_v30  ;;  %vm194_vm2 = vcmp.lt.s32.totalorder %v189_v32, %v193_v35  ;;  %338 = vset.pattern.permute.xlu0 %v442_v45  ;;  %s277_s28 = sshll.u32 %s536_s7, 4  ;;  %s278_s28 = int_to_ptr.hbm [resolvable:$true] %s277_s28 }
  0x12   :  { %147 = vadd.xlane.f32.xlu0 %v146_v7  ;;  %v207_v10 = vadd.f32 %v206_v4, %v205_v8  ;;  %v328_v41 = vsel %vm194_vm2, 1.0, %v441_v5 }
  0x13   :  { %v215_v37 = vadd.f32 %v214_v33, %v213_v31 }
  0x14   :  { %v209_v12 = vadd.f32 %v208_v9, %v207_v10 }
  0x15   :  { %v203_v13 = vld [vmem:[#allocation3] sm:$0xff]  ;;  %v216_v43 = vmul.f32 %v328_v41, %v215_v37 }
  0x16   :  { %v210_v15 = vadd.f32 %v209_v12, %v203_v13  ;;  %v197_v11 = vld [vmem:[#allocation2] sm:$0xff] }
  0x17   :  { %v212_v42 = vld [vmem:[#allocation4] sm:$0xff] }
  0x18   :  { %211 = vst.msk [vmem:[#allocation3] sm:$0xff] %vm136_vm0, %v210_v15  ;;  %v217_v46 = vadd.f32 %v216_v43, %v212_v42 }
  0x1a   :  { %152 = vadd.xlane.f32.xlu0 %v151_v14  ;;  %218 = vst.msk [vmem:[#allocation4] sm:$0xff] %vm134_vm1, %v217_v46 }
  0x1f   :  { %v234_v16 = vld [vmem:[#allocation3] sm:$0xff] }
  0x20   :  { %v235_v17 = vsel %vm136_vm0, %v234_v16, 0.0 }
  0x21   :  { %v236_v18 = vrot.slane %v235_v17, 4  ;;  %v245_v5 = vld [vmem:[#allocation4] sm:$0xff] }
  0x22   :  { %v246_v8 = vsel %vm134_vm1, %v245_v5, 0.0 }
  0x23   :  { %v237_v19 = vadd.f32 %v236_v18, %v235_v17  ;;  %v247_v9 = vrot.slane %v246_v8, 4 }
  0x25   :  { %v238_v20 = vrot.slane %v237_v19, 2  ;;  %v248_v12 = vadd.f32 %v247_v9, %v246_v8 }
  0x27   :  { %v239_v21 = vadd.f32 %v238_v20, %v237_v19  ;;  %v249_v14 = vrot.slane %v248_v12, 2  ;;  %v254_v20 = vstv %s329_s3 }
  0x29   :  { %v240_v22 = vrot.slane %v239_v21, 1  ;;  %v250_v16 = vadd.f32 %v249_v14, %v248_v12 }
  0x2b   :  { %v241_v23 = vadd.f32 %v240_v22, %v239_v21  ;;  %v251_v17 = vrot.slane %v250_v16, 1 }
  0x2d   :  { %v242_v24 = vsel %vm136_vm0, %v241_v23, 0.0  ;;  %v252_v19 = vadd.f32 %v251_v17, %v250_v16 }
  0x2e   :  { %243 = vadd.xlane.f32.xlu1 %v242_v24 }
  0x85   :  { %v148_v26 = vpop.xlane.xlu0 %147 }
  0x86   :  { %v149_v28 = vadd.f32 %v148_v26, %v142_v25 }
  0x88   :  { %v157_v29 = vand.u32 2147483647, %v149_v28  ;;  %v155_v59 = vmax.f32 %v149_v28, 0.0 }
  0x8a   :  { %v158_v34 = vsub.f32 0.0, %v157_v29  ;;  %v156_v2 = vsub.f32 %v155_v59, %v149_v28 }
  0x8c   :  { %v159_v36 = vmul.f32 1.442695, %v158_v34 }
  0x8d   :  { %v153_v38 = vpop.xlane.xlu0 %152 }
  0x8e   :  { %339 = vpow2.f32 %v159_v36  ;;  %v154_v39 = vadd.f32 %v153_v38, %v143_v30  ;;  %v232_v30 = vstv %s222_s4 }
  0x90   :  { %v172_v40 = vand.u32 2147483647, %v154_v39  ;;  %v171_v3 = vmax.f32 %v154_v39, 0.0 }
  0x92   :  { %v173_v44 = vsub.f32 0.0, %v172_v40 }
  0x94   :  { %v340_v47 = vpop.eup %339  ;;  %v174_v48 = vmul.f32 1.442695, %v173_v44 }
  0x95   :  { %v161_v49 = vadd.f32 1.0, %v340_v47  ;;  %v164_v51 = vmul.f32 -0.5, %v340_v47  ;;  %v167_v56 = vand.u32 2147483647, %v340_v47 }
  0x96   :  { %341 = vpow2.f32 %v174_v48 }
  0x97   :  { %343 = vlog2.f32 %v161_v49  ;;  %v165_v55 = vadd.f32 1.0, %v164_v51  ;;  %vm168_vm3 = vcmp.lt.f32.partialorder %v167_v56, 0.0004427343 }
  0x99   :  { %v166_v61 = vmul.f32 %v340_v47, %v165_v55 }
  0x9c   :  { %v342_v50 = vpop.eup %341 }
  0x9d   :  { %v176_v52 = vadd.f32 1.0, %v342_v50  ;;  %v179_v53 = vmul.f32 -0.5, %v342_v50  ;;  %v344_v54 = vpop.eup %343  ;;  %v182_v60 = vand.u32 2147483647, %v342_v50 }
  0x9e   :  { %v163_v57 = vmul.f32 0.6931472, %v344_v54 }
  0x9f   :  { %345 = vlog2.f32 %v176_v52  ;;  %v180_v58 = vadd.f32 1.0, %v179_v53  ;;  %vm183_vm4 = vcmp.lt.f32.partialorder %v182_v60, 0.0004427343 }
  0xa0   :  { %v169_v63 = vsel %vm168_vm3, %v166_v61, %v163_v57 }
  0xa1   :  { %v181_v1 = vmul.f32 %v342_v50, %v180_v58  ;;  %v170_v6 = vadd.f32 %v169_v63, %v156_v2  ;;  %v244_v18 = vpop.xlane.xlu1 %243 }
  0xa2   :  { %v253_v21 = vadd.f32 %v252_v19, %v244_v18 }
  0xa4   :  { %v255_v23 = vmul.f32 %v254_v20, %v253_v21 }
  0xa5   :  { %v346_v62 = vpop.eup %345 }
  0xa6   :  { %v178_v0 = vmul.f32 0.6931472, %v346_v62  ;;  %265 = vperm.xlu2 %337, %v255_v23  }
  0xa8   :  { %v184_v4 = vsel %vm183_vm4, %v181_v1, %v178_v0 }
  0xa9   :  { %v185_v7 = vadd.f32 %v184_v4, %v171_v3 }
  0xab   :  { %v198_v10 = vadd.f32 %v185_v7, %v170_v6 }
  0xad   :  { %v199_v13 = vmul.f32 %v328_v41, %v198_v10 }
  0xaf   :  { %v200_v15 = vadd.f32 %v199_v13, %v197_v11 }
  0xb1   :  { %202 = vst.msk [vmem:[#allocation2] sm:$0xff] %vm134_vm1, %v200_v15 }
  0xb8   :  { %v224_v22 = vld [vmem:[#allocation2] sm:$0xff] }
  0xb9   :  { %v225_v24 = vsel %vm134_vm1, %v224_v22, 0.0 }
  0xba   :  { %v226_v25 = vrot.slane %v225_v24, 4 }
  0xbc   :  { %v227_v26 = vadd.f32 %v226_v25, %v225_v24 }
  0xbe   :  { %v228_v27 = vrot.slane %v227_v26, 2 }
  0xc0   :  { %v229_v28 = vadd.f32 %v228_v27, %v227_v26 }
  0xc2   :  { %v230_v29 = vrot.slane %v229_v28, 1 }
  0xc4   :  { %v231_v31 = vadd.f32 %v230_v29, %v229_v28 }
  0xc6   :  { %v233_v32 = vmul.f32 %v232_v30, %v231_v31 }
  0xc8   :  { %258 = vperm.xlu1 %336, %v233_v32  }
 0x100   :  { %v266_v33 = vpop.permute.xlu2 %265 }
 0x101   :  { %269 = vst [vmem:[#allocation12] sm:$0xff] %v266_v33 }
 0x102   :  { %291 = dma.vmem_to_hbm [thread:$0]  %s287_s20, 128, %s289_s23, [#allocation13]  }
 0x13a   :  { %v259_v34 = vpop.permute.xlu1 %258 }
 0x13b   :  { %262 = vst [vmem:[#allocation11] sm:$0xff] %v259_v34 }
 0x13c   :  { %280 = dma.vmem_to_hbm [thread:$0]  %s276_s25, 128, %s278_s28, [#allocation8]  }
 0x13d   :  { %435 = dma.done.wait [#allocation8], 128  }
 0x13e   :  { %436 = vsyncadd [#allocation8], 4294967168 }
 0x13f   :  { %437 = dma.done.wait [#allocation13], 128  }
 0x140   :  { %438 = vsyncadd [#allocation13], 4294967168 }
 0x141   :  { %300 = vsyncpa [#allocation7], 1 }
 0x142   :  { %301 = vsyncpa [#allocation8], 1 }
 0x143   :  { %302 = vsyncpa [#allocation13], 1 }
 0x144   :  { %303 = vsyncpa [#allocation9], 1 }

</bundles_post_ra>
